<compile_context>
chip_gen: v7x
topology: tpu7x:2x2x1
jax: 0.10.0
libtpu: 0.0.40
codegen_flags: <defaults>
</compile_context>

<pallas_src>
import math

import jax
import jax.numpy as jnp
from jax.experimental import pallas as pl
from jax.experimental.pallas import tpu as pltpu

# Precomputed exp(+10) / exp(-10) constants (exact per-case match of
# torch.exp(-reward) up to f32 rounding).
_EXP_P10 = math.exp(10.0)    # exp(-(-10)) when touching only
_EXP_M10 = math.exp(-10.0)   # exp(-(+10)) when between only


def _reward_kernel(flags_ref, vae_ref, s_ref, out_ref):
    # flags_ref: (1,) int32 in SMEM, bit1 = is_touching, bit0 = is_between
    # vae_ref / s_ref / out_ref: (1,) float32 in SMEM
    flags = flags_ref[0]
    touch = (flags >> 1) & 1
    between = flags & 1
    # reward = -10*touch + 10*between  ->  reward in {-10, 0, +10}
    # exp(-reward) selected exactly instead of calling the EUP exp.
    exp_reward = jnp.where(
        touch == between,
        jnp.float32(1.0),
        jnp.where(touch == 1, jnp.float32(_EXP_P10), jnp.float32(_EXP_M10)),
    )
    out_ref[0] = vae_ref[0] + s_ref[0] + exp_reward


def reward_function(vae_loss, s_factor, is_touching, is_between):
    """Pallas equivalent of RewardFunction.forward.

    vae_loss, s_factor: scalar (0-d) float values.
    is_touching, is_between: bool / 0-1 values.
    Returns: float32 array of shape (1,).
    """
    vae = jnp.asarray(vae_loss, jnp.float32).reshape(1)
    s = jnp.asarray(s_factor, jnp.float32).reshape(1)
    t = jnp.asarray(is_touching).astype(jnp.int32)
    b = jnp.asarray(is_between).astype(jnp.int32)
    flags = (t * 2 + b).reshape(1)

    out = pl.pallas_call(
        _reward_kernel,
        out_shape=jax.ShapeDtypeStruct((1,), jnp.float32),
        in_specs=[
            pl.BlockSpec(memory_space=pltpu.MemorySpace.SMEM),  # packed flags
            pl.BlockSpec(memory_space=pltpu.MemorySpace.SMEM),  # vae_loss
            pl.BlockSpec(memory_space=pltpu.MemorySpace.SMEM),  # s_factor
        ],
        out_specs=pl.BlockSpec(memory_space=pltpu.MemorySpace.SMEM),
    )(flags, vae, s)

    # torch.tensor([reward_value]) has shape (1,) -> loss broadcasts to (1,)
    return out


def _reference(vae_loss, s_factor, is_touching, is_between):
    reward_value = -float(is_touching) * 10.0 + float(is_between) * 10.0
    exp_reward = jnp.exp(-jnp.asarray([reward_value], jnp.float32))
    return jnp.asarray(vae_loss, jnp.float32) + jnp.asarray(
        s_factor, jnp.float32) + exp_reward


if __name__ == "__main__":
    key = jax.random.PRNGKey(0)
    k_vae, k_s = jax.random.split(key)
    # Deterministic small scalar inputs (module has no learned parameters).
    vae_loss = jax.random.uniform(k_vae, (), jnp.float32) * 5.0   # VAE loss
    s_factor = jax.random.uniform(k_s, (), jnp.float32) * 2.0     # survival factor
    is_touching = True
    is_between = False

    out = reward_function(vae_loss, s_factor, is_touching, is_between)
    out = jax.block_until_ready(out)

    ref = _reference(vae_loss, s_factor, is_touching, is_between)
    assert out.shape == (1,)
    assert jnp.allclose(out, ref, rtol=1e-5, atol=1e-5), (out, ref)
    print("KERNEL_OK")
</pallas_src>

<mosaic_0001>
module attributes {stable_mosaic.version = 11 : i64} {
  func.func @_reward_kernel(%arg0: memref<1xi32, #tpu.memory_space<smem>>, %arg1: memref<1xf32, #tpu.memory_space<smem>>, %arg2: memref<1xf32, #tpu.memory_space<smem>>, %arg3: memref<1xf32, #tpu.memory_space<smem>>) attributes {dimension_semantics = [], scalar_prefetch = 0 : i64, scratch_operands = 0 : i64, tpu.core_type = #tpu.core_type<tc>} {
    %c0 = arith.constant 0 : index
    %0 = memref.load %arg0[%c0] : memref<1xi32, #tpu.memory_space<smem>>
    %c1_i32 = arith.constant 1 : i32
    %1 = arith.shrsi %0, %c1_i32 : i32
    %c1_i32_0 = arith.constant 1 : i32
    %2 = arith.andi %1, %c1_i32_0 : i32
    %c1_i32_1 = arith.constant 1 : i32
    %3 = arith.andi %0, %c1_i32_1 : i32
    %4 = arith.cmpi eq, %2, %3 : i32
    %c1_i32_2 = arith.constant 1 : i32
    %5 = arith.cmpi eq, %2, %c1_i32_2 : i32
    %cst = arith.constant 22026.4648 : f32
    %cst_3 = arith.constant 4.5399931E-5 : f32
    %6 = arith.select %5, %cst, %cst_3 : f32
    %cst_4 = arith.constant 1.000000e+00 : f32
    %7 = arith.select %4, %cst_4, %6 : f32
    %c0_5 = arith.constant 0 : index
    %8 = memref.load %arg1[%c0_5] : memref<1xf32, #tpu.memory_space<smem>>
    %c0_6 = arith.constant 0 : index
    %9 = memref.load %arg2[%c0_6] : memref<1xf32, #tpu.memory_space<smem>>
    %10 = arith.addf %8, %9 : f32
    %11 = arith.addf %10, %7 : f32
    %c0_7 = arith.constant 0 : index
    %12 = memref.load %arg3[%c0_7] : memref<1xf32, #tpu.memory_space<smem>>
    memref.store %11, %arg3[%c0_7] : memref<1xf32, #tpu.memory_space<smem>>
    return
  }
}

</mosaic_0001>

<bundles_post_ra>
// kernel: tpu_custom_call.1
= control target key start
LH: loop header
LB: loop body
LE: loop exit
PB: predicated region body
PF: predicated region fallthrough
CT: control target
= control target key end

     0   :  { %11 = vsyncpa [#allocation6], 0  ;;  %s103_s0 = inlined_call_operand.<no memory space> [shape: s32[1], index: 0, kind: input, shape index: {}]   ;;  %s104_s1 = inlined_call_operand.<no memory space> [shape: f32[1], index: 1, kind: input, shape index: {}]   ;;  %s105_s2 = inlined_call_operand.<no memory space> [shape: f32[1], index: 2, kind: input, shape index: {}]   ;;  %s106_s3 = inlined_call_operand.hbm [shape: f32[1], index: 3, kind: output, shape index: {}]  }
   0x1   :  { %s19_s14 = sshra.s32 %s103_s0, 1  ;;  %s21_s17 = sand.u32 1, %s103_s0 }
   0x2   :  { %s20_s18 = sand.u32 1, %s19_s14  ;;  %s28_s23 = sadd.f32 %s105_s2, %s104_s1 }
   0x3   :  { %p22_p0 = scmp.eq.s32.totalorder %s20_s18, %s21_s17  ;;  %p23_p1 = scmp.eq.s32.totalorder %s20_s18, 1 }
   0x4   :  { %s46_s28 = scalar_lea.hbm %s106_s3, 16 }
   0x5   :  { %s24_s24 = scalar_select %p23_p1, 22026.465, 4.539993e-05 }
   0x6   :  { %p47_p2 = scmp.ne.s32.totalorder %s106_s3, %s46_s28  ;;  %p50_p3 = scmp.lt.u32.totalorder %s46_s28, %s106_s3 }
   0x7   :  { %s108_s24 = smov (%p22_p0, %s24_s24), 1.0 }
   0x8   :  { %s29_s25 = sadd.f32 %s28_s23, %s108_s24  ;;  %p52_p4 = pnand %p50_p3, %p47_p2 }
   0xa   :  { %31 = sst [smem:[#allocation5]] %s29_s25 }
   0xb   :  { %55 = shalt.err (!%p52_p4)
}
   0xc   :  { %s58_s5 = smov [#allocation5]  }
   0xd   :  { %39 = dma.smem_to_hbm %s58_s5, 16, %s106_s3, [#allocation6]  }
   0xe   :  { %56 = dma.done.wait [#allocation6], 16  }
   0xf   :  { %57 = vsyncadd [#allocation6], 4294967280 }
  0x10   :  { %43 = sfence }
  0x11   :  { %44 = vsyncpa [#allocation6], 1 }

</bundles_post_ra>
